<compile_context>
chip_gen: v5e
topology: v5e:2x2
jax: 0.10.0
libtpu: 0.0.40
codegen_flags: <defaults>
</compile_context>

<pallas_src>
import math

import jax
import jax.numpy as jnp
from jax.experimental import pallas as pl
from jax.experimental.pallas import tpu as pltpu


def _euclid_dist_kernel(xs_ref, x2_ref, y_ref, y2_ref, o_ref):
    # xs_ref: (tm, dim)  gathered query rows, pre-scaled by -2
    # x2_ref: (tm, 1)    precomputed ||x||^2 (fp32)
    # y_ref : (tn, dim)  tile of all points
    # y2_ref: (1, tn)    precomputed ||y||^2 (fp32)
    # o_ref : (tm, tn)   pairwise distances
    # Cross term on the MXU, contracting dim of both operands.  This is the
    # q.k^T orientation used by flash attention; Mosaic feeds the RHS to the
    # MXU transposed without a per-step vxpose of the large points tile.
    xy = jax.lax.dot_general(
        xs_ref[...], y_ref[...],
        dimension_numbers=(((1,), (1,)), ((), ())),
        preferred_element_type=jnp.float32,
    )  # (tm, tn) == -2 * x @ y.T
    dist2 = xy + x2_ref[...] + y2_ref[...]            # broadcast adds on the VPU
    o_ref[...] = jnp.sqrt(jnp.maximum(dist2, 1e-10)).astype(o_ref.dtype)


def _round_up(a: int, b: int) -> int:
    return ((a + b - 1) // b) * b


def _shrink(t: int, unit: int) -> int:
    return max(unit, ((t // 2) // unit) * unit)


# Conservative budget that fits the v5e 16 MiB default scoped VMEM after we
# raise the limit, and leaves headroom inside v7x's 64 MiB physical VMEM.
_VMEM_BUDGET = 24 << 20


def euclidean_forward(points: jax.Array, idx: jax.Array,
                      *, tm: int = 256, tn: int = 1024,
                      use_bf16: bool = False,
                      out_dtype=jnp.float32,
                      x_resident: bool | None = None) -> jax.Array:
    """Pallas equivalent of Euclidean.forward(idx).

    points: (n, dim) float32 parameter matrix.
    idx:    (m,) integer indices.
    returns (m, n) distances sqrt(||points[idx_i] - points_j||^2), in
    out_dtype (default float32, matching the PyTorch module).

    use_bf16  : cast only the matmul operands to bf16 (halves the one-time
                points read / VMEM tile). Norms and accumulation stay fp32.
    out_dtype : bf16 output is a ~2x HBM-writeback win on v6e/v7x if the
                consumer tolerates it; default keeps fp32 semantics.
    x_resident: None = auto (resident when the gathered block fits VMEM).
    """
    n, dim = points.shape
    idx = idx.astype(jnp.int32)
    m = idx.shape[0]

    # Row gather + hoisted norms in plain JAX (computed once).
    # TODO(synk): for large m, fuse the gather, the -2 scale and the x2 norm
    # into the kernel via PrefetchScalarGridSpec(num_scalar_prefetch=1) with
    # idx in SMEM; only pays off when m*dim is large.
    x = jnp.take(points, idx, axis=0)                          # (m, dim)
    x2 = jnp.sum(jnp.square(x), axis=1, keepdims=True)         # (m, 1) fp32
    y2 = jnp.sum(jnp.square(points), axis=1, keepdims=True).T  # (1, n) fp32
    xs = -2.0 * x                                              # fold -2 into LHS

    mm_dtype = jnp.bfloat16 if use_bf16 else points.dtype
    xs_mm = xs.astype(mm_dtype)
    y_mm = points.astype(mm_dtype)

    mm_bytes = jnp.dtype(mm_dtype).itemsize
    out_bytes = jnp.dtype(out_dtype).itemsize
    # Sub-32-bit tiles pack along sublanes: require 16-row multiples for any
    # 16-bit tiled operand (full-array blocks are exempt).
    sub = 16 if (mm_bytes == 2 or out_bytes == 2) else 8
    dim_lanes = _round_up(dim, 128)   # VMEM lane padding for last dims < 128

    def vmem_est(tm_: int, tn_: int) -> int:
        # Double-buffered tiles, last dims padded to the 128-lane vreg width.
        out_t = 2 * tm_ * tn_ * out_bytes
        y_t = 2 * tn_ * dim_lanes * mm_bytes
        y2_t = 2 * 8 * tn_ * 4
        x_t = 2 * tm_ * dim_lanes * mm_bytes
        x2_t = 2 * tm_ * 128 * 4
        return out_t + y_t + y2_t + x_t + x2_t

    tn_eff = min(_round_up(tn, 128), _round_up(n, 128))

    resident = x_resident
    if resident is None:
        resident = vmem_est(m, 128) <= _VMEM_BUDGET

    if resident:
        # xs / x2 fully resident in VMEM; 1-D grid over n-tiles only.
        while tn_eff > 128 and vmem_est(m, tn_eff) > _VMEM_BUDGET:
            tn_eff = _shrink(tn_eff, 128)
        # Keep >= 2 n-tiles when possible so v7x's two TensorCores each take a
        # contiguous half of the n axis (one extra grid step elsewhere: noise).
        if n > 128:
            tn_eff = min(tn_eff, _round_up(pl.cdiv(n, 2), 128))
        tm_eff = m
        gj = pl.cdiv(n, tn_eff)
        grid = (gj,)
        in_specs = [
            pl.BlockSpec((m, dim), lambda j: (0, 0)),        # xs (resident)
            pl.BlockSpec((m, 1), lambda j: (0, 0)),          # x2 (resident)
            pl.BlockSpec((tn_eff, dim), lambda j: (j, 0)),   # points tile
            pl.BlockSpec((1, tn_eff), lambda j: (0, j)),     # y2 tile
        ]
        out_specs = pl.BlockSpec((m, tn_eff), lambda j: (0, j))
        dims = ("parallel",)
    else:
        tm_eff = min(_round_up(tm, sub), _round_up(m, sub))
        while vmem_est(tm_eff, tn_eff) > _VMEM_BUDGET and tn_eff > 128:
            tn_eff = _shrink(tn_eff, 128)
        while vmem_est(tm_eff, tn_eff) > _VMEM_BUDGET and tm_eff > sub:
            tm_eff = _shrink(tm_eff, sub)
        gi = pl.cdiv(m, tm_eff)
        gj = pl.cdiv(n, tn_eff)
        # m-axis innermost: the (tn, dim) points block stays resident in VMEM
        # across the inner sweep, so `points` is read from HBM exactly once.
        grid = (gj, gi)
        in_specs = [
            pl.BlockSpec((tm_eff, dim), lambda j, i: (i, 0)),  # xs tile
            pl.BlockSpec((tm_eff, 1), lambda j, i: (i, 0)),    # x2 tile
            pl.BlockSpec((tn_eff, dim), lambda j, i: (j, 0)),  # points tile
            pl.BlockSpec((1, tn_eff), lambda j, i: (0, j)),    # y2 tile
        ]
        out_specs = pl.BlockSpec((tm_eff, tn_eff), lambda j, i: (i, j))
        dims = ("parallel", "parallel")

    est = vmem_est(tm_eff, tn_eff)
    # Explicit scoped-VMEM limit: above v5e's 16 MiB default, headroom over the
    # estimate, and comfortably below v7x's 64 MiB physical VMEM.
    vmem_limit = int(min(48 << 20, max(32 << 20, int(1.5 * est))))

    out = pl.pallas_call(
        _euclid_dist_kernel,
        out_shape=jax.ShapeDtypeStruct((m, n), out_dtype),
        grid_spec=pltpu.PrefetchScalarGridSpec(
            num_scalar_prefetch=0,
            grid=grid,
            in_specs=in_specs,
            out_specs=out_specs,
        ),
        compiler_params=pltpu.CompilerParams(
            dimension_semantics=dims,
            vmem_limit_bytes=vmem_limit,
        ),
    )(xs_mm, x2, y_mm, y2)
    return out


def _reference(points, idx):
    x = points[idx]
    x2 = jnp.sum(jnp.square(x), axis=1, keepdims=True)
    y2 = jnp.sum(jnp.square(points), axis=1, keepdims=True)
    d2 = x2 + y2.T - 2.0 * (x @ points.T)
    return jnp.sqrt(jnp.maximum(d2, 1e-10))


if __name__ == "__main__":
    # Deterministic parameter init mirroring randompoints(n, dim):
    #   Normal(0, stdv) with stdv = 1/sqrt(dim).
    n, dim = 256, 32
    key = jax.random.PRNGKey(0)
    k_pts, k_idx = jax.random.split(key)
    stdv = 1.0 / math.sqrt(dim)
    points = stdv * jax.random.normal(k_pts, (n, dim), dtype=jnp.float32)

    m = 16
    idx = jax.random.randint(k_idx, (m,), 0, n, dtype=jnp.int32)

    # Case 1: resident-x path, multi n-tile grid.
    out = euclidean_forward(points, idx)
    jax.block_until_ready(out)
    ref = _reference(points, idx)
    assert out.shape == (m, n) and out.dtype == jnp.float32
    # sqrt near zero (self-distances) amplifies fp32 cancellation noise, so the
    # distance check is loose; the squared-distance check is tight.
    assert jnp.allclose(out, ref, atol=2e-3, rtol=1e-4)
    assert jnp.allclose(out * out, ref * ref, atol=1e-5, rtol=1e-5)

    # Case 2: ragged m, n (partial boundary blocks clipped by Pallas, no pad).
    n2, m2 = 300, 20
    pts2 = stdv * jax.random.normal(jax.random.PRNGKey(1), (n2, dim),
                                    dtype=jnp.float32)
    idx2 = jax.random.randint(jax.random.PRNGKey(2), (m2,), 0, n2,
                              dtype=jnp.int32)
    out2 = euclidean_forward(pts2, idx2)
    jax.block_until_ready(out2)
    ref2 = _reference(pts2, idx2)
    assert out2.shape == (m2, n2)
    assert jnp.allclose(out2, ref2, atol=2e-3, rtol=1e-4)
    assert jnp.allclose(out2 * out2, ref2 * ref2, atol=1e-5, rtol=1e-5)

    # Case 3: force the 2-D tiled path (ragged tiles on both axes).
    out3 = euclidean_forward(pts2, idx2, tm=16, tn=128, x_resident=False)
    jax.block_until_ready(out3)
    assert out3.shape == (m2, n2)
    assert jnp.allclose(out3, ref2, atol=2e-3, rtol=1e-4)
    assert jnp.allclose(out3 * out3, ref2 * ref2, atol=1e-5, rtol=1e-5)

    # Case 4: bf16 matmul operands (sanity: runs, finite, loose d^2 check).
    out4 = euclidean_forward(points, idx, use_bf16=True)
    jax.block_until_ready(out4)
    assert out4.shape == (m, n)
    assert bool(jnp.isfinite(out4).all())
    assert jnp.allclose(out4 * out4, ref * ref, atol=5e-2, rtol=5e-2)

    print("KERNEL_OK")
</pallas_src>

<mosaic_0001>
module attributes {stable_mosaic.version = 11 : i64} {
  func.func @_euclid_dist_kernel(%arg0: i32, %arg1: memref<16x32xf32, #tpu.memory_space<vmem>>, %arg2: memref<16x1xf32, #tpu.memory_space<vmem>>, %arg3: memref<128x32xf32, #tpu.memory_space<vmem>>, %arg4: memref<1x128xf32, #tpu.memory_space<vmem>>, %arg5: memref<16x128xf32, #tpu.memory_space<vmem>>) attributes {dimension_semantics = [#tpu.dimension_semantics<parallel>], iteration_bounds = array<i64: 2>, scalar_prefetch = 0 : i64, scratch_operands = 0 : i64, tpu.core_type = #tpu.core_type<tc>, window_params = [{pipeline_mode = #tpu.pipeline_mode<synchronous>, transform_indices = @transform_0, window_bounds = array<i64: 16, 32>}, {pipeline_mode = #tpu.pipeline_mode<synchronous>, transform_indices = @transform_1, window_bounds = array<i64: 16, 1>}, {transform_indices = @transform_2, window_bounds = array<i64: 128, 32>}, {transform_indices = @transform_3, window_bounds = array<i64: 1, 128>}, {transform_indices = @transform_4, window_bounds = array<i64: 16, 128>}]} {
    %c0 = arith.constant 0 : index
    %c0_0 = arith.constant 0 : index
    %0 = vector.load %arg1[%c0, %c0_0] : memref<16x32xf32, #tpu.memory_space<vmem>>, vector<16x32xf32>
    %c0_1 = arith.constant 0 : index
    %c0_2 = arith.constant 0 : index
    %1 = vector.load %arg3[%c0_1, %c0_2] : memref<128x32xf32, #tpu.memory_space<vmem>>, vector<128x32xf32>
    %cst = arith.constant dense<0.000000e+00> : vector<16x128xf32>
    %2 = tpu.matmul %0, %1, %cst {dimension_numbers = #tpu.dot_dimension_numbers<[1], [1], [0], [0], [0, 0, 1, 0], [], []>} : vector<16x32xf32>, vector<128x32xf32>, vector<16x128xf32> -> vector<16x128xf32>
    %c0_3 = arith.constant 0 : index
    %c0_4 = arith.constant 0 : index
    %3 = vector.load %arg2[%c0_3, %c0_4] : memref<16x1xf32, #tpu.memory_space<vmem>>, vector<16x1xf32>
    %4 = vector.broadcast %3 : vector<16x1xf32> to vector<16x128xf32>
    %5 = arith.addf %2, %4 : vector<16x128xf32>
    %c0_5 = arith.constant 0 : index
    %c0_6 = arith.constant 0 : index
    %6 = vector.load %arg4[%c0_5, %c0_6] : memref<1x128xf32, #tpu.memory_space<vmem>>, vector<1x128xf32>
    %7 = vector.broadcast %6 : vector<1x128xf32> to vector<16x128xf32>
    %8 = arith.addf %5, %7 : vector<16x128xf32>
    %cst_7 = arith.constant 1.000000e-10 : f32
    %9 = vector.broadcast %cst_7 : f32 to vector<16x128xf32>
    %10 = arith.maximumf %8, %9 : vector<16x128xf32>
    %11 = math.sqrt %10 : vector<16x128xf32>
    %c0_8 = arith.constant 0 : index
    %c0_9 = arith.constant 0 : index
    %12 = vector.load %arg5[%c0_8, %c0_9] : memref<16x128xf32, #tpu.memory_space<vmem>>, vector<16x128xf32>
    tpu.vector_store %arg5[%c0_8, %c0_9], %11 {strides = array<i32>} : memref<16x128xf32, #tpu.memory_space<vmem>>, vector<16x128xf32>,
    return
  }
  func.func @transform_0(%arg0: i32) -> (i32, i32) {
    %c0_i32 = arith.constant 0 : i32
    %c0_i32_0 = arith.constant 0 : i32
    %c0_i32_1 = arith.constant 0 : i32
    return %c0_i32, %c0_i32_0 : i32, i32
  }
  func.func @transform_1(%arg0: i32) -> (i32, i32) {
    %c0_i32 = arith.constant 0 : i32
    %c0_i32_0 = arith.constant 0 : i32
    %c0_i32_1 = arith.constant 0 : i32
    return %c0_i32, %c0_i32_0 : i32, i32
  }
  func.func @transform_2(%arg0: i32) -> (i32, i32) {
    %c0_i32 = arith.constant 0 : i32
    %c0_i32_0 = arith.constant 0 : i32
    return %arg0, %c0_i32 : i32, i32
  }
  func.func @transform_3(%arg0: i32) -> (i32, i32) {
    %c0_i32 = arith.constant 0 : i32
    %c0_i32_0 = arith.constant 0 : i32
    return %c0_i32, %arg0 : i32, i32
  }
  func.func @transform_4(%arg0: i32) -> (i32, i32) {
    %c0_i32 = arith.constant 0 : i32
    %c0_i32_0 = arith.constant 0 : i32
    return %c0_i32, %arg0 : i32, i32
  }
}

</mosaic_0001>

<bundles_post_ra>
// kernel: tpu_custom_call.1
= control target key start
LH: loop header
LB: loop body
LE: loop exit
PB: predicated region body
PF: predicated region fallthrough
CT: control target
= control target key end

     0   :  { %9 = vsyncpa [#allocation3], 0  ;;  %s795_s0 = inlined_call_operand.vmem [shape: f32[16,32], index: 0, kind: input, shape index: {}]   ;;  %s796_s1 = inlined_call_operand.vmem [shape: f32[16,1], index: 1, kind: input, shape index: {}]   ;;  %s797_s2 = inlined_call_operand.vmem [shape: f32[256,32], index: 2, kind: input, shape index: {}]   ;;  %s798_s3 = inlined_call_operand.vmem [shape: f32[1,256], index: 3, kind: input, shape index: {}]   ;;  %s799_s4 = inlined_call_operand.hbm [shape: f32[16,256], index: 4, kind: output, shape index: {}]  }
   0x1   :  { %11 = vsyncpa [#allocation3 + $0x1], 0  ;;  %s627_s15 = smov 0   ;;  %s629_s16 = smov 0  }
   0x2   :  { %s631_s17 = smov 0   ;;  %s633_s18 = smov 0  }
   0x3 LB: > { %s648_s19 = sadd.s32 4294967295, %s596_s18   ;;  %s440_s20 = sadd.s32 4294967294, %s596_s18   ;;  %s596_s18 = sphi %s633_s18, %s805_s18   ;;  %s592_s17 = sphi %s631_s17, %s804_s17   ;;  %s588_s16 = sphi %s629_s16, %s803_s16   ;;  %s584_s15 = sphi %s627_s15, %s802_s15  }
   0x4   : > { %s652_s21 = sadd.s32 1, %s596_s18   ;;  %s118_s22 = sadd.s32 1, %s592_s17 }
   0x5   : > { %s115_s23 = ssub.s32 %s596_s18, %s652_s21  ;;  %p128_p0 = scmp.ne.s32.totalorder %s592_s17, %s588_s16 }
   0x6   : > { %p116_p1 = scmp.eq.s32.totalorder %s115_s23, 0  ;;  %p129_p2 = scmp.eq.s32.totalorder %s648_s19, 1 }
   0x7   : > { %p134_p3 = scmp.ne.s32.totalorder %s588_s16, %s584_s15  ;;  %p135_p4 = scmp.eq.s32.totalorder %s440_s20, 1 }
   0x8   : > { %s663_s24 = scalar_select %p116_p1, %s592_s17, %s118_s22  }
   0x9   : > { %p665_p5 = por %p129_p2, %p128_p0  ;;  %p669_p6 = por %p135_p4, %p134_p3 }
   0xa   : > { %p443_p7 = scmp.ge.s32.totalorder %s596_s18, 1  ;;  %p174_p8 = scmp.lt.s32.totalorder %s596_s18, 3 }
   0xc   : > { %p175_p9 = pnand %p443_p7, %p174_p8 }
   0xd   : > { %s445_s27 = sshll.u32 (!%p175_p9), %s648_s19, 4  ;;  %p209_p11 = scmp.lt.s32.totalorder (!%p175_p9), %s648_s19, 1 }
   0xe   : > { %178 = sbr.rel (%p175_p9) target bundleno = 245 (0xf5), region = 36  ;;  %p204_p10 = scmp.lt.s32.totalorder (!%p175_p9), %s445_s27, 31 }
   0xf   : > { %s200_s29 = sand.u32 (!%p175_p9), 1, %s588_s16   ;;  %s554_s22 = scalar_lea.hbm (!%p175_p9), %s799_s4, 32 }
  0x10   : > { %s444_s30 = sshll.u32 (!%p175_p9), %s200_s29, 4 }
  0x11   : > { %s202_s9 = scalar_lea.vmem (!%p175_p9), [#allocation2], %s444_s30 }
  0x12   : > { %s366_s10 = sshll.u32 (!%p175_p9), %s202_s9, 4  ;;  %s763_s10 = int_to_ptr.vmem [resolvable:$true] %s366_s10 }
  0x13   : > { %s807_s27 = smov (!%p204_p10, %s445_s27), 31  ;;  %vm242_vm0 = vcmask 261120   ;;  %v230_v7 = vld [vmem:[%s796_s1] sm:$0xff]  ;;  %v598_v9 = vmov 0   ;;  %v231_v11 = vld [vmem:[%s796_s1 + $0x8] sm:$0xff] }
  0x14   : > { %s446_s28 = sshll.u32 %s807_s27, 3  ;;  %528 = vset.pattern.permute.xlu0 %v598_v9  ;;  %v212_v19 = vld [vmem:[%s795_s0] sm:$0xff]  ;;  %v213_v20 = vld [vmem:[%s795_s0 + $0x8] sm:$0xff] }
  0x15   : > { %s679_s5 = scalar_lea.vmem %s797_s2, %s446_s28  ;;  %234 = vperm.xlu0 %528, %v230_v7  }
  0x16   : > { %v229_v0 = vld [vmem:[%s679_s5 + $0x78] sm:$0xff]  ;;  %v228_v1 = vld [vmem:[%s679_s5 + $0x70] sm:$0xff]  ;;  %v227_v2 = vld [vmem:[%s679_s5 + $0x68] sm:$0xff]  ;;  %s702_s6 = scalar_select %p209_p11, %s648_s19, 1 }
  0x17   : > { %447 = vmatpush.xpose.msk.msra.mxu0 %vm242_vm0, %v229_v0  ;;  %469 = vmatpush.xpose.msk.msra.mxu1 %vm242_vm0, %v229_v0  ;;  %v226_v3 = vld [vmem:[%s679_s5 + $0x60] sm:$0xff]  ;;  %v225_v4 = vld [vmem:[%s679_s5 + $0x58] sm:$0xff]  ;;  %v224_v5 = vld [vmem:[%s679_s5 + $0x50] sm:$0xff] }
  0x18   : > { %v223_v6 = vld [vmem:[%s679_s5 + $0x48] sm:$0xff]  ;;  %s211_s11 = scalar_lea.vmem %s798_s3, %s702_s6  ;;  %v222_v8 = vld [vmem:[%s679_s5 + $0x40] sm:$0xff]  ;;  %v221_v10 = vld [vmem:[%s679_s5 + $0x38] sm:$0xff] }
  0x19   : > { %v220_v12 = vld [vmem:[%s679_s5 + $0x30] sm:$0xff]  ;;  %v219_v13 = vld [vmem:[%s679_s5 + $0x28] sm:$0xff]  ;;  %v218_v14 = vld [vmem:[%s679_s5 + $0x20] sm:$0xff] }
  0x1a   : > { %v217_v15 = vld [vmem:[%s679_s5 + $0x18] sm:$0xff]  ;;  %v216_v16 = vld [vmem:[%s679_s5 + $0x10] sm:$0xff]  ;;  %v215_v17 = vld [vmem:[%s679_s5 + $0x8] sm:$0xff] }
  0x1b   : > { %448 = vmatpush.xpose.msk.msra.mxu0 %vm242_vm0, %v228_v1  ;;  %470 = vmatpush.xpose.msk.msra.mxu1 %vm242_vm0, %v228_v1  ;;  %v214_v18 = vld [vmem:[%s679_s5] sm:$0xff]  ;;  %s466_s5 = sshll.u32 %s648_s19, 3  ;;  %s355_s19 = scalar_lea.sflag [#allocation3], %s200_s29 }
  0x1c   : > { %v529_v23 = vld [vmem:[%s211_s11] ss:$0 sm:$0xff]  ;;  %s365_s8 = scalar_lea.hbm %s799_s4, %s466_s5 }
  0x1d   : > { %239 = vperm.xlu0 %528, %v231_v11   ;;  %s368_s11 = sshll.u32 %s365_s8, 4  ;;  %s369_s11 = int_to_ptr.hbm [resolvable:$true] %s368_s11 }
  0x1e   : > { %s548_s12 = sshra.s32 %s369_s11, 4  ;;  %s549_s12 = int_to_ptr.hbm [resolvable:$true] %s548_s12 }
  0x1f   : > { %449 = vmatpush.xpose.msk.msra.mxu0 %vm242_vm0, %v227_v2  ;;  %471 = vmatpush.xpose.msk.msra.mxu1 %vm242_vm0, %v227_v2  ;;  %s550_s13 = scalar_lea.hbm %s549_s12, 16  ;;  %p555_p1 = scmp.lt.s32.totalorder %s549_s12, %s799_s4 }
  0x20   : > { %p551_p12 = scmp.ne.s32.totalorder %s549_s12, %s550_s13  ;;  %p556_p2 = scmp.lt.s32.totalorder %s554_s22, %s550_s13 }
  0x22   : > { %p552_p13 = pnand %p551_p12, %p665_p5  ;;  %p557_p3 = por %p556_p2, %p555_p1 }
  0x23   : > { %450 = vmatpush.xpose.msk.msra.mxu0 %vm242_vm0, %v226_v3  ;;  %472 = vmatpush.xpose.msk.msra.mxu1 %vm242_vm0, %v226_v3 }
  0x24   : > { %p553_p0 = pneg %p552_p13 }
  0x26   : > { %p558_p4 = pnand %p557_p3, %p553_p0 }
  0x27   : > { %451 = vmatpush.xpose.msk.msra.mxu0 %vm242_vm0, %v225_v4  ;;  %473 = vmatpush.xpose.msk.msra.mxu1 %vm242_vm0, %v225_v4 }
  0x2b   : > { %452 = vmatpush.xpose.msk.msra.mxu0 %vm242_vm0, %v224_v5  ;;  %474 = vmatpush.xpose.msk.msra.mxu1 %vm242_vm0, %v224_v5 }
  0x2f   : > { %453 = vmatpush.xpose.msk.msra.mxu0 %vm242_vm0, %v223_v6  ;;  %475 = vmatpush.xpose.msk.msra.mxu1 %vm242_vm0, %v223_v6 }
  0x33   : > { %454 = vmatpush.xpose.msk.msra.mxu0 %vm242_vm0, %v222_v8  ;;  %476 = vmatpush.xpose.msk.msra.mxu1 %vm242_vm0, %v222_v8 }
  0x37   : > { %455 = vmatpush.xpose.msk.msra.mxu0 %vm242_vm0, %v221_v10  ;;  %477 = vmatpush.xpose.msk.msra.mxu1 %vm242_vm0, %v221_v10 }
  0x3b   : > { %456 = vmatpush.xpose.msk.msra.mxu0 %vm242_vm0, %v220_v12  ;;  %478 = vmatpush.xpose.msk.msra.mxu1 %vm242_vm0, %v220_v12 }
  0x3f   : > { %457 = vmatpush.xpose.msk.msra.mxu0 %vm242_vm0, %v219_v13  ;;  %479 = vmatpush.xpose.msk.msra.mxu1 %vm242_vm0, %v219_v13 }
  0x43   : > { %458 = vmatpush.xpose.msk.msra.mxu0 %vm242_vm0, %v218_v14  ;;  %480 = vmatpush.xpose.msk.msra.mxu1 %vm242_vm0, %v218_v14 }
  0x47   : > { %459 = vmatpush.xpose.msk.msra.mxu0 %vm242_vm0, %v217_v15  ;;  %481 = vmatpush.xpose.msk.msra.mxu1 %vm242_vm0, %v217_v15 }
  0x4b   : > { %460 = vmatpush.xpose.msk.msra.mxu0 %vm242_vm0, %v216_v16  ;;  %482 = vmatpush.xpose.msk.msra.mxu1 %vm242_vm0, %v216_v16 }
  0x4f   : > { %461 = vmatpush.xpose.msk.msra.mxu0 %vm242_vm0, %v215_v17  ;;  %483 = vmatpush.xpose.msk.msra.mxu1 %vm242_vm0, %v215_v17 }
  0x53   : > { %462 = vmatpush.xpose.msk.msra.mxu0 %vm242_vm0, %v214_v18  ;;  %484 = vmatpush.xpose.msk.msra.mxu1 %vm242_vm0, %v214_v18 }
  0x56   : > { %463 = vmatmul.msk.f32.vlgmr.msra.gmra.mxu0 %vm242_vm0, %v212_v19  ;;  %464 = vmatmul.msk.f32.vlgmr.msra.gmra.mxu1 %vm242_vm0, %v213_v20 }
  0x87   : > { %v235_v21 = vpop.permute.xlu0 %234 }
  0x8f   : > { %v240_v22 = vpop.permute.xlu0 %239 }
  0xd3   : > { %v314_v24 = vpop.f32.mrf.mxu0  ;;  %v317_v25 = vpop.f32.mrf.mxu1 }
  0xd4   : > { %v315_v26 = vadd.f32 %v314_v24, %v235_v21  ;;  %v318_v27 = vadd.f32 %v317_v25, %v240_v22 }
  0xd6   : > { %v324_v28 = vadd.f32 %v529_v23, %v315_v26  ;;  %v325_v29 = vadd.f32 %v529_v23, %v318_v27 }
  0xd8   : > { %v326_v30 = vmax.f32 %v324_v28, 1e-10  ;;  %v327_v31 = vmax.f32 %v325_v29, 1e-10 }
  0xda   : > { %530 = vrsqrt.f32 %v326_v30  ;;  %vm335_vm1 = vcmp.eq.f32.partialorder %v326_v30, inf  ;;  %v338_v45 = vand.u32 2147483648, %v326_v30  ;;  %vm337_vm2 = vcmp.eq.f32.partialorder %v326_v30, 0.0 }
  0xdb   : > { %532 = vrsqrt.f32 %v327_v31  ;;  %vm347_vm3 = vcmp.eq.f32.partialorder %v327_v31, inf  ;;  %v350_v48 = vand.u32 2147483648, %v327_v31  ;;  %vm349_vm4 = vcmp.eq.f32.partialorder %v327_v31, 0.0 }
  0xe0   : > { %v531_v32 = vpop.eup %530 }
  0xe1   : > { %v533_v33 = vpop.eup %532  ;;  %v329_v34 = vmul.f32 %v531_v32, %v326_v30 }
  0xe2   : > { %v341_v35 = vmul.f32 %v533_v33, %v327_v31 }
  0xe3   : > { %v330_v36 = vmul.f32 %v531_v32, %v329_v34 }
  0xe4   : > { %v342_v37 = vmul.f32 %v533_v33, %v341_v35 }
  0xe5   : > { %v331_v38 = vmul.f32 0.5, %v330_v36 }
  0xe6   : > { %v343_v39 = vmul.f32 0.5, %v342_v37 }
  0xe7   : > { %v332_v40 = vsub.f32 1.5, %v331_v38 }
  0xe8   : > { %v344_v41 = vsub.f32 1.5, %v343_v39 }
  0xe9   : > { %v333_v42 = vmul.f32 %v531_v32, %v332_v40 }
  0xea   : > { %v345_v43 = vmul.f32 %v533_v33, %v344_v41 }
  0xeb   : > { %v334_v44 = vmul.f32 %v333_v42, %v326_v30 }
  0xec   : > { %v346_v46 = vmul.f32 %v345_v43, %v327_v31 }
  0xed   : > { %v336_v47 = vsel %vm335_vm1, %v326_v30, %v334_v44 }
  0xee   : > { %v339_v49 = vsel %vm337_vm2, %v338_v45, %v336_v47  ;;  %v348_v50 = vsel %vm347_vm3, %v327_v31, %v346_v46 }
  0xef   : > { %v351_v51 = vsel %vm349_vm4, %v350_v48, %v348_v50  ;;  %352 = vst [vmem:[%s202_s9] sm:$0xff] %v339_v49 }
  0xf0   : > { %353 = vst [vmem:[%s202_s9 + $0x8] sm:$0xff] %v351_v51 }
  0xf1   : > { %561 = shalt.err (!%p558_p4)
}
  0xf2   : > { %s599_s28 = smov 128   ;;  %s600_s29 = smov 256  }
  0xf3   : > { %s601_s30 = smov 8  }
  0xf4   : > { %485 = dma.vmem_to_hbm [thread:$0]  (%p665_p5), %s763_s10, 256, %s369_s11, %s355_s19, %s599_s28, %s600_s29, %s601_s30  }
  0xf5 PF: > { %p491_p7 = scmp.ge.s32.totalorder %s596_s18, 2  ;;  %s383_s5 = sand.u32 1, %s584_s15  }
  0xf6   : > { %s384_s6 = scalar_lea.sflag [#allocation3], %s383_s5 }
  0xf7   : > { %p488_p8 = pnand %p491_p7, %p669_p6 }
  0xf9   : > { %p489_p9 = pneg %p488_p8 }
  0xfb   : > { %579 = dma.done.wait (%p489_p9), %s384_s6, 256  }
  0xfc   : > { %581 = vsyncadd (%p489_p9), %s384_s6, 4294967040  ;;  %p14_p10 = scmp.ge.s32.totalorder %s652_s21, 4   ;;  %s802_s15 = smov %s588_s16 }
  0xfd   : > { %s803_s16 = smov %s592_s17  ;;  %s804_s17 = smov %s663_s24 }
  0xfe   : > { %s805_s18 = smov %s652_s21  ;;  %16 = sbr.rel (!%p14_p10) target bundleno = 3 (0x3), region = 74 }
 0x103   :  { %390 = vsyncpa [#allocation3], 1 }
 0x104   :  { %392 = vsyncpa [#allocation3 + $0x1], 1 }

</bundles_post_ra>
